<compile_context>
chip_gen: v7x
topology: tpu7x:2x2x1
jax: 0.10.0
libtpu: 0.0.40
codegen_flags: <defaults>
</compile_context>

<pallas_src>
import jax
import jax.numpy as jnp
from jax.experimental import pallas as pl
from jax.experimental.pallas import tpu as pltpu

STATE_DIM = 2
ACTION_DIM = 1
IN_DIM = STATE_DIM + ACTION_DIM   # 3
HIDDEN_DIM = 10
OUT_DIM = STATE_DIM               # 2


def _round_up(n, m):
    return ((n + m - 1) // m) * m


def _net2_kernel(w1_ref, w2_ref, x_ref, o_ref):
    # w1_ref: [HIDDEN_DIM, IN_DIM]   (SMEM, PyTorch lay1.weight layout)
    # w2_ref: [OUT_DIM, HIDDEN_DIM]  (SMEM, PyTorch lay2.weight layout)
    # x_ref : [IN_DIM, R, 128]       (VMEM, batch dense on (sublane, lane))
    # o_ref : [OUT_DIM, R, 128]      (VMEM)
    # Load the three feature slabs once; upcast covers the bf16-DMA option.
    x = [x_ref[j].astype(jnp.float32) for j in range(IN_DIM)]   # each [R, 128]

    # Fused form: out[o] = sum_k w2[o,k] * relu(sum_j w1[k,j] * x[j]).
    # h[k] is consumed immediately -> only x (3) + hk (1) + acc (2) slabs live.
    acc = [None] * OUT_DIM
    for k in range(HIDDEN_DIM):
        hk = w1_ref[k, 0] * x[0]
        for j in range(1, IN_DIM):
            hk = hk + w1_ref[k, j] * x[j]
        hk = jnp.maximum(hk, 0.0)                               # ReLU
        for o in range(OUT_DIM):
            t = w2_ref[o, k] * hk
            acc[o] = t if acc[o] is None else acc[o] + t

    for o in range(OUT_DIM):
        o_ref[o] = acc[o].astype(o_ref.dtype)                   # [R,128] dense store


def net2_forward_feature_major(x_t, w1, w2, *, block_rows=2048, dma_dtype=None):
    """Net2 forward on feature-major input (zero extra wrapper HBM passes).

    Args:
      x_t: [IN_DIM, B] activations (feature-major).
      w1 : [HIDDEN_DIM, IN_DIM]   (PyTorch lay1.weight)
      w2 : [OUT_DIM, HIDDEN_DIM]  (PyTorch lay2.weight)
      block_rows: batch tile along the (B//128) axis; rounded up to x8.
                  Default 2048 -> 3 MiB in / 2 MiB out per grid step.
      dma_dtype : optional narrower DMA dtype (e.g. jnp.bfloat16) to halve
                  input HBM bytes on v6e/v7x; compute stays f32.
    Returns:
      [OUT_DIM, B] float32.
    """
    in_dim, B = x_t.shape
    assert in_dim == IN_DIM
    if dma_dtype is not None and x_t.dtype != dma_dtype:
        x_t = x_t.astype(dma_dtype)

    n128 = pl.cdiv(B, 128)
    b_pad = n128 * 128
    if b_pad != B:
        # Minimal (<128 lanes) pad so the free reshape below is legal; the
        # ragged last grid block along the R axis is masked by Pallas.
        x_t = jnp.pad(x_t, ((0, 0), (0, b_pad - B)))
    x3 = x_t.reshape(IN_DIM, n128, 128)          # free row-major reshape

    # Block along the middle (R) axis: either the full axis (always legal) or
    # a multiple of 8 (Pallas masks the partial tail block).
    if n128 <= _round_up(block_rows, 8):
        r_block = n128
    else:
        r_block = _round_up(block_rows, 8)
    grid = (pl.cdiv(n128, r_block),)

    itemsize = jnp.dtype(x3.dtype).itemsize
    cost = pl.CostEstimate(
        flops=2 * (IN_DIM * HIDDEN_DIM + HIDDEN_DIM * OUT_DIM) * b_pad,
        transcendentals=0,
        bytes_accessed=(IN_DIM * itemsize + OUT_DIM * 4) * b_pad,
    )

    out3 = pl.pallas_call(
        _net2_kernel,
        out_shape=jax.ShapeDtypeStruct((OUT_DIM, n128, 128), jnp.float32),
        grid_spec=pltpu.PrefetchScalarGridSpec(
            num_scalar_prefetch=0,
            grid=grid,
            in_specs=[
                # Tiny weights: whole arrays, SMEM-resident scalar reads,
                # never re-fetched across grid steps.
                pl.BlockSpec(memory_space=pltpu.MemorySpace.SMEM),
                pl.BlockSpec(memory_space=pltpu.MemorySpace.SMEM),
                # Activations: one dense (IN_DIM, r_block, 128) tile per step.
                pl.BlockSpec((IN_DIM, r_block, 128), lambda i: (0, i, 0)),
            ],
            out_specs=pl.BlockSpec((OUT_DIM, r_block, 128), lambda i: (0, i, 0)),
        ),
        compiler_params=pltpu.CompilerParams(
            dimension_semantics=("parallel",),     # 2 TensorCores on v7x
            vmem_limit_bytes=48 * 1024 * 1024,     # <= v7x 64 MiB physical
        ),
        cost_estimate=cost,
    )(w1.astype(jnp.float32), w2.astype(jnp.float32), x3)

    out_t = out3.reshape(OUT_DIM, b_pad)
    if b_pad != B:
        out_t = out_t[:, :B]
    return out_t


def net2_forward(x, w1, w2, *, block_rows=2048, dma_dtype=None,
                 min_pallas_batch=512):
    """PyTorch-layout wrapper: x [B, IN_DIM] -> [B, OUT_DIM].

    NOTE: the batch-major layout costs one transpose in / one out (extra HBM
    passes); prefer net2_forward_feature_major when the producer/consumer can
    use [IN_DIM, B] / [OUT_DIM, B] directly.  Tiny batches use plain XLA
    (launch + DMA overhead dwarfs ~100 flops/row).
    """
    B = x.shape[0]
    if B < min_pallas_batch:
        h = jnp.maximum(
            jnp.einsum("bi,hi->bh", x, w1, precision=jax.lax.Precision.HIGHEST),
            0.0)
        return jnp.einsum("bh,oh->bo", h, w2,
                          precision=jax.lax.Precision.HIGHEST)
    out_t = net2_forward_feature_major(
        jnp.transpose(x), w1, w2, block_rows=block_rows, dma_dtype=dma_dtype)
    return jnp.transpose(out_t)


def net2_reference(x, w1, w2):
    """Exact-f32 reference (same semantics as the PyTorch forward)."""
    h = jnp.maximum(
        jnp.einsum("bi,hi->bh", x, w1, precision=jax.lax.Precision.HIGHEST),
        0.0)
    return jnp.einsum("bh,oh->bo", h, w2,
                      precision=jax.lax.Precision.HIGHEST)


if __name__ == "__main__":
    key = jax.random.PRNGKey(0)
    kx, k1, k2 = jax.random.split(key, 3)

    # PyTorch parameter layouts: lay1.weight [10, 3], lay2.weight [2, 10],
    # initialised ~ N(0, 0.5) like .normal_(0, 0.5).
    w1 = 0.5 * jax.random.normal(k1, (HIDDEN_DIM, IN_DIM), dtype=jnp.float32)
    w2 = 0.5 * jax.random.normal(k2, (OUT_DIM, HIDDEN_DIM), dtype=jnp.float32)

    # --- feature-major path (primary API, zero wrapper copies) -------------
    B = 512
    x = jax.random.normal(kx, (B, IN_DIM), dtype=jnp.float32)
    out_t = jax.block_until_ready(
        net2_forward_feature_major(jnp.transpose(x), w1, w2))
    ref = net2_reference(x, w1, w2)
    assert out_t.shape == (OUT_DIM, B)
    assert jnp.allclose(jnp.transpose(out_t), ref, atol=1e-5, rtol=1e-5)

    # --- ragged batch (B % 128 != 0): minimal pad + Pallas-masked tail -----
    B_r = 300
    x_r = jax.random.normal(kx, (B_r, IN_DIM), dtype=jnp.float32)
    out_r = jax.block_until_ready(
        net2_forward(x_r, w1, w2, min_pallas_batch=1))
    ref_r = net2_reference(x_r, w1, w2)
    assert out_r.shape == (B_r, OUT_DIM)
    assert jnp.allclose(out_r, ref_r, atol=1e-5, rtol=1e-5)

    # --- multi-block grid (exercise the pipelined path) --------------------
    B_big = 2048
    x_big = jax.random.normal(kx, (B_big, IN_DIM), dtype=jnp.float32)
    out_big = jax.block_until_ready(
        net2_forward(x_big, w1, w2, block_rows=8, min_pallas_batch=1))
    ref_big = net2_reference(x_big, w1, w2)
    assert out_big.shape == (B_big, OUT_DIM)
    assert jnp.allclose(out_big, ref_big, atol=1e-5, rtol=1e-5)

    # --- optional bf16-DMA path (halves input HBM bytes; compute stays f32)
    out_bf = jax.block_until_ready(
        net2_forward(x, w1, w2, dma_dtype=jnp.bfloat16, min_pallas_batch=1))
    assert jnp.allclose(out_bf, ref, atol=5e-2, rtol=5e-2)

    # --- tiny batch through the dispatcher falls back to plain XLA ---------
    x_small = x[:8]
    out_fb = jax.block_until_ready(net2_forward(x_small, w1, w2))
    assert jnp.allclose(out_fb, net2_reference(x_small, w1, w2),
                        atol=1e-5, rtol=1e-5)

    print("KERNEL_OK")
</pallas_src>

<mosaic_0001>
module attributes {stable_mosaic.version = 11 : i64} {
  func.func @_net2_kernel(%arg0: i32, %arg1: memref<10x3xf32, #tpu.memory_space<smem>>, %arg2: memref<2x10xf32, #tpu.memory_space<smem>>, %arg3: memref<3x4x128xf32, #tpu.memory_space<vmem>>, %arg4: memref<2x4x128xf32, #tpu.memory_space<vmem>>) attributes {dimension_semantics = [#tpu.dimension_semantics<parallel>], iteration_bounds = array<i64: 1>, scalar_prefetch = 0 : i64, scratch_operands = 0 : i64, tpu.core_type = #tpu.core_type<tc>, window_params = [{transform_indices = @transform_0, window_bounds = array<i64: 10, 3>}, {transform_indices = @transform_1, window_bounds = array<i64: 2, 10>}, {transform_indices = @transform_2, window_bounds = array<i64: 3, 4, 128>}, {transform_indices = @transform_3, window_bounds = array<i64: 2, 4, 128>}]} {
    %c0 = arith.constant 0 : index
    %c0_0 = arith.constant 0 : index
    %c0_1 = arith.constant 0 : index
    %0 = vector.load %arg3[%c0, %c0_0, %c0_1] : memref<3x4x128xf32, #tpu.memory_space<vmem>>, vector<1x4x128xf32>
    %1 = vector.shape_cast %0 : vector<1x4x128xf32> to vector<4x128xf32>
    %c1 = arith.constant 1 : index
    %c0_2 = arith.constant 0 : index
    %c0_3 = arith.constant 0 : index
    %2 = vector.load %arg3[%c1, %c0_2, %c0_3] : memref<3x4x128xf32, #tpu.memory_space<vmem>>, vector<1x4x128xf32>
    %3 = vector.shape_cast %2 : vector<1x4x128xf32> to vector<4x128xf32>
    %c2 = arith.constant 2 : index
    %c0_4 = arith.constant 0 : index
    %c0_5 = arith.constant 0 : index
    %4 = vector.load %arg3[%c2, %c0_4, %c0_5] : memref<3x4x128xf32, #tpu.memory_space<vmem>>, vector<1x4x128xf32>
    %5 = vector.shape_cast %4 : vector<1x4x128xf32> to vector<4x128xf32>
    %c0_6 = arith.constant 0 : index
    %c0_7 = arith.constant 0 : index
    %6 = memref.load %arg1[%c0_6, %c0_7] : memref<10x3xf32, #tpu.memory_space<smem>>
    %7 = vector.broadcast %6 : f32 to vector<4x128xf32>
    %8 = arith.mulf %7, %1 : vector<4x128xf32>
    %c0_8 = arith.constant 0 : index
    %c1_9 = arith.constant 1 : index
    %9 = memref.load %arg1[%c0_8, %c1_9] : memref<10x3xf32, #tpu.memory_space<smem>>
    %10 = vector.broadcast %9 : f32 to vector<4x128xf32>
    %11 = arith.mulf %10, %3 : vector<4x128xf32>
    %12 = arith.addf %8, %11 : vector<4x128xf32>
    %c0_10 = arith.constant 0 : index
    %c2_11 = arith.constant 2 : index
    %13 = memref.load %arg1[%c0_10, %c2_11] : memref<10x3xf32, #tpu.memory_space<smem>>
    %14 = vector.broadcast %13 : f32 to vector<4x128xf32>
    %15 = arith.mulf %14, %5 : vector<4x128xf32>
    %16 = arith.addf %12, %15 : vector<4x128xf32>
    %cst = arith.constant 0.000000e+00 : f32
    %17 = vector.broadcast %cst : f32 to vector<4x128xf32>
    %18 = arith.maximumf %16, %17 : vector<4x128xf32>
    %c0_12 = arith.constant 0 : index
    %c0_13 = arith.constant 0 : index
    %19 = memref.load %arg2[%c0_12, %c0_13] : memref<2x10xf32, #tpu.memory_space<smem>>
    %20 = vector.broadcast %19 : f32 to vector<4x128xf32>
    %21 = arith.mulf %20, %18 : vector<4x128xf32>
    %c1_14 = arith.constant 1 : index
    %c0_15 = arith.constant 0 : index
    %22 = memref.load %arg2[%c1_14, %c0_15] : memref<2x10xf32, #tpu.memory_space<smem>>
    %23 = vector.broadcast %22 : f32 to vector<4x128xf32>
    %24 = arith.mulf %23, %18 : vector<4x128xf32>
    %c1_16 = arith.constant 1 : index
    %c0_17 = arith.constant 0 : index
    %25 = memref.load %arg1[%c1_16, %c0_17] : memref<10x3xf32, #tpu.memory_space<smem>>
    %26 = vector.broadcast %25 : f32 to vector<4x128xf32>
    %27 = arith.mulf %26, %1 : vector<4x128xf32>
    %c1_18 = arith.constant 1 : index
    %c1_19 = arith.constant 1 : index
    %28 = memref.load %arg1[%c1_18, %c1_19] : memref<10x3xf32, #tpu.memory_space<smem>>
    %29 = vector.broadcast %28 : f32 to vector<4x128xf32>
    %30 = arith.mulf %29, %3 : vector<4x128xf32>
    %31 = arith.addf %27, %30 : vector<4x128xf32>
    %c1_20 = arith.constant 1 : index
    %c2_21 = arith.constant 2 : index
    %32 = memref.load %arg1[%c1_20, %c2_21] : memref<10x3xf32, #tpu.memory_space<smem>>
    %33 = vector.broadcast %32 : f32 to vector<4x128xf32>
    %34 = arith.mulf %33, %5 : vector<4x128xf32>
    %35 = arith.addf %31, %34 : vector<4x128xf32>
    %cst_22 = arith.constant 0.000000e+00 : f32
    %36 = vector.broadcast %cst_22 : f32 to vector<4x128xf32>
    %37 = arith.maximumf %35, %36 : vector<4x128xf32>
    %c0_23 = arith.constant 0 : index
    %c1_24 = arith.constant 1 : index
    %38 = memref.load %arg2[%c0_23, %c1_24] : memref<2x10xf32, #tpu.memory_space<smem>>
    %39 = vector.broadcast %38 : f32 to vector<4x128xf32>
    %40 = arith.mulf %39, %37 : vector<4x128xf32>
    %41 = arith.addf %21, %40 : vector<4x128xf32>
    %c1_25 = arith.constant 1 : index
    %c1_26 = arith.constant 1 : index
    %42 = memref.load %arg2[%c1_25, %c1_26] : memref<2x10xf32, #tpu.memory_space<smem>>
    %43 = vector.broadcast %42 : f32 to vector<4x128xf32>
    %44 = arith.mulf %43, %37 : vector<4x128xf32>
    %45 = arith.addf %24, %44 : vector<4x128xf32>
    %c2_27 = arith.constant 2 : index
    %c0_28 = arith.constant 0 : index
    %46 = memref.load %arg1[%c2_27, %c0_28] : memref<10x3xf32, #tpu.memory_space<smem>>
    %47 = vector.broadcast %46 : f32 to vector<4x128xf32>
    %48 = arith.mulf %47, %1 : vector<4x128xf32>
    %c2_29 = arith.constant 2 : index
    %c1_30 = arith.constant 1 : index
    %49 = memref.load %arg1[%c2_29, %c1_30] : memref<10x3xf32, #tpu.memory_space<smem>>
    %50 = vector.broadcast %49 : f32 to vector<4x128xf32>
    %51 = arith.mulf %50, %3 : vector<4x128xf32>
    %52 = arith.addf %48, %51 : vector<4x128xf32>
    %c2_31 = arith.constant 2 : index
    %c2_32 = arith.constant 2 : index
    %53 = memref.load %arg1[%c2_31, %c2_32] : memref<10x3xf32, #tpu.memory_space<smem>>
    %54 = vector.broadcast %53 : f32 to vector<4x128xf32>
    %55 = arith.mulf %54, %5 : vector<4x128xf32>
    %56 = arith.addf %52, %55 : vector<4x128xf32>
    %cst_33 = arith.constant 0.000000e+00 : f32
    %57 = vector.broadcast %cst_33 : f32 to vector<4x128xf32>
    %58 = arith.maximumf %56, %57 : vector<4x128xf32>
    %c0_34 = arith.constant 0 : index
    %c2_35 = arith.constant 2 : index
    %59 = memref.load %arg2[%c0_34, %c2_35] : memref<2x10xf32, #tpu.memory_space<smem>>
    %60 = vector.broadcast %59 : f32 to vector<4x128xf32>
    %61 = arith.mulf %60, %58 : vector<4x128xf32>
    %62 = arith.addf %41, %61 : vector<4x128xf32>
    %c1_36 = arith.constant 1 : index
    %c2_37 = arith.constant 2 : index
    %63 = memref.load %arg2[%c1_36, %c2_37] : memref<2x10xf32, #tpu.memory_space<smem>>
    %64 = vector.broadcast %63 : f32 to vector<4x128xf32>
    %65 = arith.mulf %64, %58 : vector<4x128xf32>
    %66 = arith.addf %45, %65 : vector<4x128xf32>
    %c3 = arith.constant 3 : index
    %c0_38 = arith.constant 0 : index
    %67 = memref.load %arg1[%c3, %c0_38] : memref<10x3xf32, #tpu.memory_space<smem>>
    %68 = vector.broadcast %67 : f32 to vector<4x128xf32>
    %69 = arith.mulf %68, %1 : vector<4x128xf32>
    %c3_39 = arith.constant 3 : index
    %c1_40 = arith.constant 1 : index
    %70 = memref.load %arg1[%c3_39, %c1_40] : memref<10x3xf32, #tpu.memory_space<smem>>
    %71 = vector.broadcast %70 : f32 to vector<4x128xf32>
    %72 = arith.mulf %71, %3 : vector<4x128xf32>
    %73 = arith.addf %69, %72 : vector<4x128xf32>
    %c3_41 = arith.constant 3 : index
    %c2_42 = arith.constant 2 : index
    %74 = memref.load %arg1[%c3_41, %c2_42] : memref<10x3xf32, #tpu.memory_space<smem>>
    %75 = vector.broadcast %74 : f32 to vector<4x128xf32>
    %76 = arith.mulf %75, %5 : vector<4x128xf32>
    %77 = arith.addf %73, %76 : vector<4x128xf32>
    %cst_43 = arith.constant 0.000000e+00 : f32
    %78 = vector.broadcast %cst_43 : f32 to vector<4x128xf32>
    %79 = arith.maximumf %77, %78 : vector<4x128xf32>
    %c0_44 = arith.constant 0 : index
    %c3_45 = arith.constant 3 : index
    %80 = memref.load %arg2[%c0_44, %c3_45] : memref<2x10xf32, #tpu.memory_space<smem>>
    %81 = vector.broadcast %80 : f32 to vector<4x128xf32>
    %82 = arith.mulf %81, %79 : vector<4x128xf32>
    %83 = arith.addf %62, %82 : vector<4x128xf32>
    %c1_46 = arith.constant 1 : index
    %c3_47 = arith.constant 3 : index
    %84 = memref.load %arg2[%c1_46, %c3_47] : memref<2x10xf32, #tpu.memory_space<smem>>
    %85 = vector.broadcast %84 : f32 to vector<4x128xf32>
    %86 = arith.mulf %85, %79 : vector<4x128xf32>
    %87 = arith.addf %66, %86 : vector<4x128xf32>
    %c4 = arith.constant 4 : index
    %c0_48 = arith.constant 0 : index
    %88 = memref.load %arg1[%c4, %c0_48] : memref<10x3xf32, #tpu.memory_space<smem>>
    %89 = vector.broadcast %88 : f32 to vector<4x128xf32>
    %90 = arith.mulf %89, %1 : vector<4x128xf32>
    %c4_49 = arith.constant 4 : index
    %c1_50 = arith.constant 1 : index
    %91 = memref.load %arg1[%c4_49, %c1_50] : memref<10x3xf32, #tpu.memory_space<smem>>
    %92 = vector.broadcast %91 : f32 to vector<4x128xf32>
    %93 = arith.mulf %92, %3 : vector<4x128xf32>
    %94 = arith.addf %90, %93 : vector<4x128xf32>
    %c4_51 = arith.constant 4 : index
    %c2_52 = arith.constant 2 : index
    %95 = memref.load %arg1[%c4_51, %c2_52] : memref<10x3xf32, #tpu.memory_space<smem>>
    %96 = vector.broadcast %95 : f32 to vector<4x128xf32>
    %97 = arith.mulf %96, %5 : vector<4x128xf32>
    %98 = arith.addf %94, %97 : vector<4x128xf32>
    %cst_53 = arith.constant 0.000000e+00 : f32
    %99 = vector.broadcast %cst_53 : f32 to vector<4x128xf32>
    %100 = arith.maximumf %98, %99 : vector<4x128xf32>
    %c0_54 = arith.constant 0 : index
    %c4_55 = arith.constant 4 : index
    %101 = memref.load %arg2[%c0_54, %c4_55] : memref<2x10xf32, #tpu.memory_space<smem>>
    %102 = vector.broadcast %101 : f32 to vector<4x128xf32>
    %103 = arith.mulf %102, %100 : vector<4x128xf32>
    %104 = arith.addf %83, %103 : vector<4x128xf32>
    %c1_56 = arith.constant 1 : index
    %c4_57 = arith.constant 4 : index
    %105 = memref.load %arg2[%c1_56, %c4_57] : memref<2x10xf32, #tpu.memory_space<smem>>
    %106 = vector.broadcast %105 : f32 to vector<4x128xf32>
    %107 = arith.mulf %106, %100 : vector<4x128xf32>
    %108 = arith.addf %87, %107 : vector<4x128xf32>
    %c5 = arith.constant 5 : index
    %c0_58 = arith.constant 0 : index
    %109 = memref.load %arg1[%c5, %c0_58] : memref<10x3xf32, #tpu.memory_space<smem>>
    %110 = vector.broadcast %109 : f32 to vector<4x128xf32>
    %111 = arith.mulf %110, %1 : vector<4x128xf32>
    %c5_59 = arith.constant 5 : index
    %c1_60 = arith.constant 1 : index
    %112 = memref.load %arg1[%c5_59, %c1_60] : memref<10x3xf32, #tpu.memory_space<smem>>
    %113 = vector.broadcast %112 : f32 to vector<4x128xf32>
    %114 = arith.mulf %113, %3 : vector<4x128xf32>
    %115 = arith.addf %111, %114 : vector<4x128xf32>
    %c5_61 = arith.constant 5 : index
    %c2_62 = arith.constant 2 : index
    %116 = memref.load %arg1[%c5_61, %c2_62] : memref<10x3xf32, #tpu.memory_space<smem>>
    %117 = vector.broadcast %116 : f32 to vector<4x128xf32>
    %118 = arith.mulf %117, %5 : vector<4x128xf32>
    %119 = arith.addf %115, %118 : vector<4x128xf32>
    %cst_63 = arith.constant 0.000000e+00 : f32
    %120 = vector.broadcast %cst_63 : f32 to vector<4x128xf32>
    %121 = arith.maximumf %119, %120 : vector<4x128xf32>
    %c0_64 = arith.constant 0 : index
    %c5_65 = arith.constant 5 : index
    %122 = memref.load %arg2[%c0_64, %c5_65] : memref<2x10xf32, #tpu.memory_space<smem>>
    %123 = vector.broadcast %122 : f32 to vector<4x128xf32>
    %124 = arith.mulf %123, %121 : vector<4x128xf32>
    %125 = arith.addf %104, %124 : vector<4x128xf32>
    %c1_66 = arith.constant 1 : index
    %c5_67 = arith.constant 5 : index
    %126 = memref.load %arg2[%c1_66, %c5_67] : memref<2x10xf32, #tpu.memory_space<smem>>
    %127 = vector.broadcast %126 : f32 to vector<4x128xf32>
    %128 = arith.mulf %127, %121 : vector<4x128xf32>
    %129 = arith.addf %108, %128 : vector<4x128xf32>
    %c6 = arith.constant 6 : index
    %c0_68 = arith.constant 0 : index
    %130 = memref.load %arg1[%c6, %c0_68] : memref<10x3xf32, #tpu.memory_space<smem>>
    %131 = vector.broadcast %130 : f32 to vector<4x128xf32>
    %132 = arith.mulf %131, %1 : vector<4x128xf32>
    %c6_69 = arith.constant 6 : index
    %c1_70 = arith.constant 1 : index
    %133 = memref.load %arg1[%c6_69, %c1_70] : memref<10x3xf32, #tpu.memory_space<smem>>
    %134 = vector.broadcast %133 : f32 to vector<4x128xf32>
    %135 = arith.mulf %134, %3 : vector<4x128xf32>
    %136 = arith.addf %132, %135 : vector<4x128xf32>
    %c6_71 = arith.constant 6 : index
    %c2_72 = arith.constant 2 : index
    %137 = memref.load %arg1[%c6_71, %c2_72] : memref<10x3xf32, #tpu.memory_space<smem>>
    %138 = vector.broadcast %137 : f32 to vector<4x128xf32>
    %139 = arith.mulf %138, %5 : vector<4x128xf32>
    %140 = arith.addf %136, %139 : vector<4x128xf32>
    %cst_73 = arith.constant 0.000000e+00 : f32
    %141 = vector.broadcast %cst_73 : f32 to vector<4x128xf32>
    %142 = arith.maximumf %140, %141 : vector<4x128xf32>
    %c0_74 = arith.constant 0 : index
    %c6_75 = arith.constant 6 : index
    %143 = memref.load %arg2[%c0_74, %c6_75] : memref<2x10xf32, #tpu.memory_space<smem>>
    %144 = vector.broadcast %143 : f32 to vector<4x128xf32>
    %145 = arith.mulf %144, %142 : vector<4x128xf32>
    %146 = arith.addf %125, %145 : vector<4x128xf32>
    %c1_76 = arith.constant 1 : index
    %c6_77 = arith.constant 6 : index
    %147 = memref.load %arg2[%c1_76, %c6_77] : memref<2x10xf32, #tpu.memory_space<smem>>
    %148 = vector.broadcast %147 : f32 to vector<4x128xf32>
    %149 = arith.mulf %148, %142 : vector<4x128xf32>
    %150 = arith.addf %129, %149 : vector<4x128xf32>
    %c7 = arith.constant 7 : index
    %c0_78 = arith.constant 0 : index
    %151 = memref.load %arg1[%c7, %c0_78] : memref<10x3xf32, #tpu.memory_space<smem>>
    %152 = vector.broadcast %151 : f32 to vector<4x128xf32>
    %153 = arith.mulf %152, %1 : vector<4x128xf32>
    %c7_79 = arith.constant 7 : index
    %c1_80 = arith.constant 1 : index
    %154 = memref.load %arg1[%c7_79, %c1_80] : memref<10x3xf32, #tpu.memory_space<smem>>
    %155 = vector.broadcast %154 : f32 to vector<4x128xf32>
    %156 = arith.mulf %155, %3 : vector<4x128xf32>
    %157 = arith.addf %153, %156 : vector<4x128xf32>
    %c7_81 = arith.constant 7 : index
    %c2_82 = arith.constant 2 : index
    %158 = memref.load %arg1[%c7_81, %c2_82] : memref<10x3xf32, #tpu.memory_space<smem>>
    %159 = vector.broadcast %158 : f32 to vector<4x128xf32>
    %160 = arith.mulf %159, %5 : vector<4x128xf32>
    %161 = arith.addf %157, %160 : vector<4x128xf32>
    %cst_83 = arith.constant 0.000000e+00 : f32
    %162 = vector.broadcast %cst_83 : f32 to vector<4x128xf32>
    %163 = arith.maximumf %161, %162 : vector<4x128xf32>
    %c0_84 = arith.constant 0 : index
    %c7_85 = arith.constant 7 : index
    %164 = memref.load %arg2[%c0_84, %c7_85] : memref<2x10xf32, #tpu.memory_space<smem>>
    %165 = vector.broadcast %164 : f32 to vector<4x128xf32>
    %166 = arith.mulf %165, %163 : vector<4x128xf32>
    %167 = arith.addf %146, %166 : vector<4x128xf32>
    %c1_86 = arith.constant 1 : index
    %c7_87 = arith.constant 7 : index
    %168 = memref.load %arg2[%c1_86, %c7_87] : memref<2x10xf32, #tpu.memory_space<smem>>
    %169 = vector.broadcast %168 : f32 to vector<4x128xf32>
    %170 = arith.mulf %169, %163 : vector<4x128xf32>
    %171 = arith.addf %150, %170 : vector<4x128xf32>
    %c8 = arith.constant 8 : index
    %c0_88 = arith.constant 0 : index
    %172 = memref.load %arg1[%c8, %c0_88] : memref<10x3xf32, #tpu.memory_space<smem>>
    %173 = vector.broadcast %172 : f32 to vector<4x128xf32>
    %174 = arith.mulf %173, %1 : vector<4x128xf32>
    %c8_89 = arith.constant 8 : index
    %c1_90 = arith.constant 1 : index
    %175 = memref.load %arg1[%c8_89, %c1_90] : memref<10x3xf32, #tpu.memory_space<smem>>
    %176 = vector.broadcast %175 : f32 to vector<4x128xf32>
    %177 = arith.mulf %176, %3 : vector<4x128xf32>
    %178 = arith.addf %174, %177 : vector<4x128xf32>
    %c8_91 = arith.constant 8 : index
    %c2_92 = arith.constant 2 : index
    %179 = memref.load %arg1[%c8_91, %c2_92] : memref<10x3xf32, #tpu.memory_space<smem>>
    %180 = vector.broadcast %179 : f32 to vector<4x128xf32>
    %181 = arith.mulf %180, %5 : vector<4x128xf32>
    %182 = arith.addf %178, %181 : vector<4x128xf32>
    %cst_93 = arith.constant 0.000000e+00 : f32
    %183 = vector.broadcast %cst_93 : f32 to vector<4x128xf32>
    %184 = arith.maximumf %182, %183 : vector<4x128xf32>
    %c0_94 = arith.constant 0 : index
    %c8_95 = arith.constant 8 : index
    %185 = memref.load %arg2[%c0_94, %c8_95] : memref<2x10xf32, #tpu.memory_space<smem>>
    %186 = vector.broadcast %185 : f32 to vector<4x128xf32>
    %187 = arith.mulf %186, %184 : vector<4x128xf32>
    %188 = arith.addf %167, %187 : vector<4x128xf32>
    %c1_96 = arith.constant 1 : index
    %c8_97 = arith.constant 8 : index
    %189 = memref.load %arg2[%c1_96, %c8_97] : memref<2x10xf32, #tpu.memory_space<smem>>
    %190 = vector.broadcast %189 : f32 to vector<4x128xf32>
    %191 = arith.mulf %190, %184 : vector<4x128xf32>
    %192 = arith.addf %171, %191 : vector<4x128xf32>
    %c9 = arith.constant 9 : index
    %c0_98 = arith.constant 0 : index
    %193 = memref.load %arg1[%c9, %c0_98] : memref<10x3xf32, #tpu.memory_space<smem>>
    %194 = vector.broadcast %193 : f32 to vector<4x128xf32>
    %195 = arith.mulf %194, %1 : vector<4x128xf32>
    %c9_99 = arith.constant 9 : index
    %c1_100 = arith.constant 1 : index
    %196 = memref.load %arg1[%c9_99, %c1_100] : memref<10x3xf32, #tpu.memory_space<smem>>
    %197 = vector.broadcast %196 : f32 to vector<4x128xf32>
    %198 = arith.mulf %197, %3 : vector<4x128xf32>
    %199 = arith.addf %195, %198 : vector<4x128xf32>
    %c9_101 = arith.constant 9 : index
    %c2_102 = arith.constant 2 : index
    %200 = memref.load %arg1[%c9_101, %c2_102] : memref<10x3xf32, #tpu.memory_space<smem>>
    %201 = vector.broadcast %200 : f32 to vector<4x128xf32>
    %202 = arith.mulf %201, %5 : vector<4x128xf32>
    %203 = arith.addf %199, %202 : vector<4x128xf32>
    %cst_103 = arith.constant 0.000000e+00 : f32
    %204 = vector.broadcast %cst_103 : f32 to vector<4x128xf32>
    %205 = arith.maximumf %203, %204 : vector<4x128xf32>
    %c0_104 = arith.constant 0 : index
    %c9_105 = arith.constant 9 : index
    %206 = memref.load %arg2[%c0_104, %c9_105] : memref<2x10xf32, #tpu.memory_space<smem>>
    %207 = vector.broadcast %206 : f32 to vector<4x128xf32>
    %208 = arith.mulf %207, %205 : vector<4x128xf32>
    %209 = arith.addf %188, %208 : vector<4x128xf32>
    %c1_106 = arith.constant 1 : index
    %c9_107 = arith.constant 9 : index
    %210 = memref.load %arg2[%c1_106, %c9_107] : memref<2x10xf32, #tpu.memory_space<smem>>
    %211 = vector.broadcast %210 : f32 to vector<4x128xf32>
    %212 = arith.mulf %211, %205 : vector<4x128xf32>
    %213 = arith.addf %192, %212 : vector<4x128xf32>
    %c0_108 = arith.constant 0 : index
    %c0_109 = arith.constant 0 : index
    %c0_110 = arith.constant 0 : index
    %214 = vector.load %arg4[%c0_108, %c0_109, %c0_110] : memref<2x4x128xf32, #tpu.memory_space<vmem>>, vector<1x4x128xf32>
    %215 = vector.shape_cast %214 : vector<1x4x128xf32> to vector<4x128xf32>
    %216 = vector.shape_cast %209 : vector<4x128xf32> to vector<1x4x128xf32>
    tpu.vector_store %arg4[%c0_108, %c0_109, %c0_110], %216 {strides = array<i32>} : memref<2x4x128xf32, #tpu.memory_space<vmem>>, vector<1x4x128xf32>,
    %c1_111 = arith.constant 1 : index
    %c0_112 = arith.constant 0 : index
    %c0_113 = arith.constant 0 : index
    %217 = vector.load %arg4[%c1_111, %c0_112, %c0_113] : memref<2x4x128xf32, #tpu.memory_space<vmem>>, vector<1x4x128xf32>
    %218 = vector.shape_cast %217 : vector<1x4x128xf32> to vector<4x128xf32>
    %219 = vector.shape_cast %213 : vector<4x128xf32> to vector<1x4x128xf32>
    tpu.vector_store %arg4[%c1_111, %c0_112, %c0_113], %219 {strides = array<i32>} : memref<2x4x128xf32, #tpu.memory_space<vmem>>, vector<1x4x128xf32>,
    return
  }
  func.func @transform_0(%arg0: i32) -> (i32, i32) {
    %c0_i32 = arith.constant 0 : i32
    %c0_i32_0 = arith.constant 0 : i32
    %c0_i32_1 = arith.constant 0 : i32
    return %c0_i32, %c0_i32_0 : i32, i32
  }
  func.func @transform_1(%arg0: i32) -> (i32, i32) {
    %c0_i32 = arith.constant 0 : i32
    %c0_i32_0 = arith.constant 0 : i32
    %c0_i32_1 = arith.constant 0 : i32
    return %c0_i32, %c0_i32_0 : i32, i32
  }
  func.func @transform_2(%arg0: i32) -> (i32, i32, i32) {
    %c0_i32 = arith.constant 0 : i32
    %c0_i32_0 = arith.constant 0 : i32
    %c0_i32_1 = arith.constant 0 : i32
    return %c0_i32, %arg0, %c0_i32_0 : i32, i32, i32
  }
  func.func @transform_3(%arg0: i32) -> (i32, i32, i32) {
    %c0_i32 = arith.constant 0 : i32
    %c0_i32_0 = arith.constant 0 : i32
    %c0_i32_1 = arith.constant 0 : i32
    return %c0_i32, %arg0, %c0_i32_0 : i32, i32, i32
  }
}

</mosaic_0001>

<bundles_post_ra>
// kernel: tpu_custom_call.1
= control target key start
LH: loop header
LB: loop body
LE: loop exit
PB: predicated region body
PF: predicated region fallthrough
CT: control target
= control target key end

     0   :  { %8 = vsyncpa [#allocation4], 0  ;;  %s591_s0 = inlined_call_operand.vmem [shape: f32[10,3], index: 0, kind: input, shape index: {}]   ;;  %s592_s1 = inlined_call_operand.vmem [shape: f32[2,10], index: 1, kind: input, shape index: {}]   ;;  %s593_s2 = inlined_call_operand.vmem [shape: f32[3,4,128], index: 2, kind: input, shape index: {}]   ;;  %s594_s3 = inlined_call_operand.hbm [shape: f32[2,4,128], index: 3, kind: output, shape index: {}]  }
   0x1   :  { %9 = vsyncpa [#allocation6], 0 }
   0x2   :  { %10 = vsyncpa [#allocation3], 0  ;;  %s16_s14 = sshll.u32 %s591_s0, 4  ;;  %s29_s17 = sshll.u32 %s592_s1, 4  ;;  %s17_s14 = int_to_ptr.vmem [resolvable:$true] %s16_s14  ;;  %s30_s17 = int_to_ptr.vmem [resolvable:$true] %s29_s17 }
   0x3   :  { %s323_s18 = scalar_lea.vmem %s17_s14, 256  ;;  %p328_p1 = scmp.lt.s32.totalorder %s17_s14, %s17_s14 }
   0x4   :  { %p324_p0 = scmp.ne.s32.totalorder %s17_s14, %s323_s18  ;;  %p329_p2 = scmp.lt.s32.totalorder %s323_s18, %s323_s18 }
   0x6   :  { %p330_p3 = por %p329_p2, %p328_p1 }
   0x8   :  { %p331_p4 = pnand %p330_p3, %p324_p0 }
   0xa   :  { %334 = shalt.err (!%p331_p4)
}
   0xb   :  { %s375_s19 = smov [#allocation2]   ;;  %s376_s20 = smov 128  }
   0xc   :  { %s377_s21 = smov 8   ;;  %s335_s22 = scalar_lea.vmem %s30_s17, 32 }
   0xd   :  { %22 = dma.vmem_to_smem %s17_s14, 256, %s375_s19, [#allocation4], %s376_s20, %s376_s20, %s377_s21  }
   0xe   :  { %p336_p5 = scmp.ne.s32.totalorder %s30_s17, %s335_s22  ;;  %p340_p6 = scmp.lt.s32.totalorder %s30_s17, %s30_s17 }
   0xf   :  { %p341_p7 = scmp.lt.s32.totalorder %s335_s22, %s335_s22 }
  0x11   :  { %p342_p8 = por %p341_p7, %p340_p6 }
  0x13   :  { %p343_p9 = pnand %p342_p8, %p336_p5 }
  0x15   :  { %346 = shalt.err (!%p343_p9)
}
  0x16   :  { %s378_s0 = smov [#allocation5]  }
  0x17   :  { %32 = dma.vmem_to_smem %s30_s17, 32, %s378_s0, [#allocation6]  }
  0x18   :  { %369 = dma.done.wait [#allocation4], 256  }
  0x19   :  { %370 = vsyncadd [#allocation4], 4294967040 }
  0x1a   :  { %371 = dma.done.wait [#allocation6], 32  }
  0x1b   :  { %372 = vsyncadd [#allocation6], 4294967264 }
  0x1c   :  { %41 = sfence }
  0x1d   :  { %s47_s1 = sld [smem:[#allocation2]]  ;;  %s268_s23 = sld [smem:[#allocation2 + $0x1]]  ;;  %v415_v0 = vld [vmem:[%s593_s2] sm:$0xf]  ;;  %v420_v1 = vld [vmem:[%s593_s2 + $0x4] sm:$0xf] }
  0x1e   :  { %s269_s24 = sld [smem:[#allocation2 + $0x2]]  ;;  %s408_s25 = sld [smem:[#allocation5]]  ;;  %v429_v2 = vld [vmem:[%s593_s2 + $0x8] sm:$0xf] }
  0x1f   :  { %s410_s26 = sld [smem:[#allocation5 + $0x80]]  ;;  %s272_s30 = sld [smem:[#allocation2 + $0x81]] }
  0x20   :  { %s271_s27 = sld [smem:[#allocation2 + $0x80]]  ;;  %s273_s4 = sld [smem:[#allocation2 + $0x82]] }
  0x21   :  { %s422_s7 = sld [smem:[#allocation5 + $0x1]]  ;;  %s431_s11 = sld [smem:[#allocation2 + $0x100]] }
  0x22   :  { %s424_s8 = sld [smem:[#allocation5 + $0x81]]  ;;  %s435_s13 = sld [smem:[#allocation2 + $0x102]] }
  0x23   :  { %s433_s12 = sld [smem:[#allocation2 + $0x101]]  ;;  %v48_v3 = vstv %s47_s1  ;;  %v51_v4 = vstv %s268_s23  ;;  %s437_s14 = sld [smem:[#allocation5 + $0x2]] }
  0x24   :  { %v49_v5 = vmul.f32 %v48_v3, %v415_v0  ;;  %v52_v6 = vmul.f32 %v420_v1, %v51_v4  ;;  %v55_v7 = vstv %s269_s24  ;;  %s441_s15 = sld [smem:[#allocation5 + $0x82]]  ;;  %s443_s2 = sld [smem:[#allocation2 + $0x180]]  ;;  %v60_v9 = vstv %s408_s25 }
  0x25   :  { %v56_v8 = vmul.f32 %v429_v2, %v55_v7  ;;  %s447_s16 = sld [smem:[#allocation2 + $0x181]]  ;;  %s449_s17 = sld [smem:[#allocation2 + $0x182]]  ;;  %v69_v13 = vstv %s272_s30  ;;  %v63_v15 = vstv %s410_s26 }
  0x26   :  { %v66_v10 = vstv %s271_s27  ;;  %v53_v11 = vadd.f32 %v52_v6, %v49_v5  ;;  %v73_v14 = vstv %s273_s4  ;;  %s452_s18 = sld [smem:[#allocation5 + $0x3]]  ;;  %v70_v16 = vmul.f32 %v420_v1, %v69_v13  ;;  %s460_s20 = sld [smem:[#allocation2 + $0x200]] }
  0x27   :  { %v67_v12 = vmul.f32 %v66_v10, %v415_v0  ;;  %s454_s19 = sld [smem:[#allocation5 + $0x83]]  ;;  %v74_v17 = vmul.f32 %v429_v2, %v73_v14  ;;  %v78_v18 = vstv %s422_s7  ;;  %s462_s21 = sld [smem:[#allocation2 + $0x201]]  ;;  %v86_v21 = vstv %s431_s11 }
  0x28   :  { %v57_v19 = vadd.f32 %v56_v8, %v53_v11  ;;  %v82_v20 = vstv %s424_s8  ;;  %s467_s22 = sld [smem:[#allocation2 + $0x202]]  ;;  %s469_s0 = sld [smem:[#allocation5 + $0x4]]  ;;  %v87_v24 = vmul.f32 %v86_v21, %v415_v0  ;;  %v93_v26 = vstv %s435_s13 }
  0x29   :  { %v89_v22 = vstv %s433_s12  ;;  %v71_v23 = vadd.f32 %v70_v16, %v67_v12  ;;  %v94_v28 = vmul.f32 %v429_v2, %v93_v26  ;;  %v98_v29 = vstv %s437_s14  ;;  %s477_s1 = sld [smem:[#allocation5 + $0x84]]  ;;  %s481_s23 = sld [smem:[#allocation2 + $0x280]] }
  0x2a   :  { %v90_v25 = vmul.f32 %v420_v1, %v89_v22  ;;  %v58_v27 = vmax.f32 %v57_v19, 0.0  ;;  %v102_v30 = vstv %s441_s15  ;;  %v106_v33 = vstv %s443_s2  ;;  %s483_s24 = sld [smem:[#allocation2 + $0x281]]  ;;  %s487_s25 = sld [smem:[#allocation2 + $0x282]] }
  0x2b   :  { %v75_v31 = vadd.f32 %v74_v17, %v71_v23  ;;  %v109_v34 = vstv %s447_s16  ;;  %v107_v37 = vmul.f32 %v106_v33, %v415_v0  ;;  %v113_v41 = vstv %s449_s17  ;;  %s491_s26 = sld [smem:[#allocation5 + $0x5]]  ;;  %s498_s28 = sld [smem:[#allocation2 + $0x300]] }
  0x2c   :  { %v91_v32 = vadd.f32 %v90_v25, %v87_v24  ;;  %v61_v35 = vmul.f32 %v60_v9, %v58_v27  ;;  %v64_v36 = vmul.f32 %v63_v15, %v58_v27  ;;  %v110_v38 = vmul.f32 %v420_v1, %v109_v34  ;;  %s493_s27 = sld [smem:[#allocation5 + $0x85]]  ;;  %s501_s29 = sld [smem:[#allocation2 + $0x301]] }
  0x2d   :  { %v76_v39 = vmax.f32 %v75_v31, 0.0  ;;  %v118_v42 = vstv %s452_s18  ;;  %v114_v44 = vmul.f32 %v429_v2, %v113_v41  ;;  %v122_v45 = vstv %s454_s19  ;;  %s503_s30 = sld [smem:[#allocation2 + $0x302]]  ;;  %s508_s4 = sld [smem:[#allocation5 + $0x6]] }
  0x2e   :  { %v95_v40 = vadd.f32 %v94_v28, %v91_v32  ;;  %v111_v43 = vadd.f32 %v110_v38, %v107_v37  ;;  %v126_v46 = vstv %s460_s20  ;;  %v129_v52 = vstv %s462_s21  ;;  %s510_s5 = sld [smem:[#allocation5 + $0x86]]  ;;  %s512_s6 = sld [smem:[#allocation2 + $0x380]] }
  0x2f   :  { %v79_v47 = vmul.f32 %v78_v18, %v76_v39  ;;  %v83_v48 = vmul.f32 %v82_v20, %v76_v39  ;;  %v127_v50 = vmul.f32 %v126_v46, %v415_v0  ;;  %v133_v53 = vstv %s467_s22  ;;  %s517_s7 = sld [smem:[#allocation2 + $0x381]]  ;;  %s521_s8 = sld [smem:[#allocation2 + $0x382]] }
  0x30   :  { %v96_v49 = vmax.f32 %v95_v40, 0.0  ;;  %v115_v51 = vadd.f32 %v114_v44, %v111_v43  ;;  %v138_v54 = vstv %s469_s0  ;;  %v130_v60 = vmul.f32 %v420_v1, %v129_v52  ;;  %s523_s9 = sld [smem:[#allocation5 + $0x7]]  ;;  %s533_s11 = sld [smem:[#allocation2 + $0x400]] }
  0x31   :  { %v80_v55 = vadd.f32 %v79_v47, %v61_v35  ;;  %v84_v56 = vadd.f32 %v83_v48, %v64_v36  ;;  %v134_v61 = vmul.f32 %v429_v2, %v133_v53  ;;  %v142_v62 = vstv %s477_s1  ;;  %s530_s10 = sld [smem:[#allocation5 + $0x87]]  ;;  %s535_s12 = sld [smem:[#allocation2 + $0x401]] }
  0x32   :  { %v99_v57 = vmul.f32 %v98_v29, %v96_v49  ;;  %v103_v58 = vmul.f32 %v102_v30, %v96_v49  ;;  %v116_v59 = vmax.f32 %v115_v51, 0.0  ;;  %v146_v4 = vstv %s481_s23  ;;  %s543_s13 = sld [smem:[#allocation2 + $0x402]]  ;;  %s548_s14 = sld [smem:[#allocation5 + $0x8]] }
  0x33   :  { %v149_v5 = vstv %s483_s24  ;;  %v131_v8 = vadd.f32 %v130_v60, %v127_v50  ;;  %v147_v9 = vmul.f32 %v146_v4, %v415_v0  ;;  %v153_v11 = vstv %s487_s25  ;;  %s550_s15 = sld [smem:[#allocation5 + $0x88]]  ;;  %s558_s16 = sld [smem:[#allocation2 + $0x481]] }
  0x34   :  { %v100_v63 = vadd.f32 %v99_v57, %v80_v55  ;;  %v104_v3 = vadd.f32 %v103_v58, %v84_v56  ;;  %v119_v6 = vmul.f32 %v118_v42, %v116_v59  ;;  %v123_v7 = vmul.f32 %v122_v45, %v116_v59  ;;  %s553_s2 = sld [smem:[#allocation2 + $0x480]]  ;;  %s560_s17 = sld [smem:[#allocation2 + $0x482]] }
  0x35   :  { %v150_v10 = vmul.f32 %v420_v1, %v149_v5  ;;  %v158_v12 = vstv %s491_s26  ;;  %v162_v13 = vstv %s493_s27  ;;  %v135_v16 = vadd.f32 %v134_v61, %v131_v8  ;;  %s314_s18 = sld [smem:[#allocation5 + $0x9]]  ;;  %s379_s20 = smov [#allocation7]  }
  0x36   :  { %v120_v14 = vadd.f32 %v119_v6, %v100_v63  ;;  %v124_v15 = vadd.f32 %v123_v7, %v104_v3  ;;  %v154_v17 = vmul.f32 %v429_v2, %v153_v11  ;;  %v166_v19 = vstv %s498_s28  ;;  %s315_s19 = sld [smem:[#allocation5 + $0x89]]  ;;  %s253_s21 = sshll.u32 %s379_s20, 4  ;;  %s254_s21 = int_to_ptr.vmem [resolvable:$true] %s253_s21 }
  0x37   :  { %v151_v18 = vadd.f32 %v150_v10, %v147_v9  ;;  %v169_v20 = vstv %s501_s29  ;;  %v173_v21 = vstv %s503_s30  ;;  %v136_v22 = vmax.f32 %v135_v16, 0.0  ;;  %s347_s22 = scalar_lea.vmem %s254_s21, 128  ;;  %p352_p11 = scmp.lt.s32.totalorder %s254_s21, %s254_s21 }
  0x38   :  { %v167_v23 = vmul.f32 %v166_v19, %v415_v0  ;;  %v170_v24 = vmul.f32 %v420_v1, %v169_v20  ;;  %v174_v25 = vmul.f32 %v429_v2, %v173_v21  ;;  %v178_v27 = vstv %s508_s4  ;;  %p348_p10 = scmp.ne.s32.totalorder %s254_s21, %s347_s22  ;;  %p353_p12 = scmp.lt.s32.totalorder %s347_s22, %s347_s22 }
  0x39   :  { %v155_v26 = vadd.f32 %v154_v17, %v151_v18  ;;  %v182_v28 = vstv %s510_s5  ;;  %v186_v29 = vstv %s512_s6  ;;  %v139_v30 = vmul.f32 %v138_v54, %v136_v22 }
  0x3a   :  { %v143_v31 = vmul.f32 %v142_v62, %v136_v22  ;;  %v171_v32 = vadd.f32 %v170_v24, %v167_v23  ;;  %v187_v33 = vmul.f32 %v186_v29, %v415_v0  ;;  %v189_v35 = vstv %s517_s7  ;;  %p354_p13 = por %p353_p12, %p352_p11 }
  0x3b   :  { %v156_v34 = vmax.f32 %v155_v26, 0.0  ;;  %v193_v36 = vstv %s521_s8  ;;  %v198_v37 = vstv %s523_s9  ;;  %v140_v38 = vadd.f32 %v139_v30, %v120_v14 }
  0x3c   :  { %v144_v39 = vadd.f32 %v143_v31, %v124_v15  ;;  %v175_v40 = vadd.f32 %v174_v25, %v171_v32  ;;  %v190_v41 = vmul.f32 %v420_v1, %v189_v35  ;;  %v194_v44 = vmul.f32 %v429_v2, %v193_v36  ;;  %p355_p0 = pnand %p354_p13, %p348_p10 }
  0x3d   :  { %v159_v42 = vmul.f32 %v158_v12, %v156_v34  ;;  %v163_v43 = vmul.f32 %v162_v13, %v156_v34  ;;  %v202_v45 = vstv %s530_s10  ;;  %v206_v48 = vstv %s533_s11 }
  0x3e   :  { %v176_v46 = vmax.f32 %v175_v40, 0.0  ;;  %v191_v47 = vadd.f32 %v190_v41, %v187_v33  ;;  %v209_v49 = vstv %s535_s12  ;;  %v207_v52 = vmul.f32 %v206_v48, %v415_v0 }
  0x3f   :  { %v160_v50 = vadd.f32 %v159_v42, %v140_v38  ;;  %v164_v51 = vadd.f32 %v163_v43, %v144_v39  ;;  %v210_v53 = vmul.f32 %v420_v1, %v209_v49  ;;  %v213_v57 = vstv %s543_s13 }
  0x40   :  { %v179_v54 = vmul.f32 %v178_v27, %v176_v46  ;;  %v183_v55 = vmul.f32 %v182_v28, %v176_v46  ;;  %v195_v56 = vadd.f32 %v194_v44, %v191_v47  ;;  %v214_v59 = vmul.f32 %v429_v2, %v213_v57 }
  0x41   :  { %v211_v58 = vadd.f32 %v210_v53, %v207_v52  ;;  %v218_v60 = vstv %s548_s14  ;;  %v222_v61 = vstv %s550_s15  ;;  %v226_v4 = vstv %s553_s2 }
  0x42   :  { %v180_v62 = vadd.f32 %v179_v54, %v160_v50  ;;  %v184_v63 = vadd.f32 %v183_v55, %v164_v51  ;;  %v196_v3 = vmax.f32 %v195_v56, 0.0  ;;  %v227_v6 = vmul.f32 %v226_v4, %v415_v0 }
  0x43   :  { %v215_v5 = vadd.f32 %v214_v59, %v211_v58  ;;  %v229_v7 = vstv %s558_s16  ;;  %v233_v8 = vstv %s560_s17  ;;  %v238_v20 = vstv %s314_s18 }
  0x44   :  { %v199_v9 = vmul.f32 %v198_v37, %v196_v3  ;;  %v203_v10 = vmul.f32 %v202_v45, %v196_v3  ;;  %v230_v11 = vmul.f32 %v420_v1, %v229_v7  ;;  %v234_v12 = vmul.f32 %v429_v2, %v233_v8 }
  0x45   :  { %v216_v13 = vmax.f32 %v215_v5, 0.0  ;;  %v242_v21 = vstv %s315_s19 }
  0x46   :  { %v200_v14 = vadd.f32 %v199_v9, %v180_v62  ;;  %v204_v15 = vadd.f32 %v203_v10, %v184_v63  ;;  %v231_v16 = vadd.f32 %v230_v11, %v227_v6 }
  0x47   :  { %v219_v17 = vmul.f32 %v218_v60, %v216_v13  ;;  %v223_v18 = vmul.f32 %v222_v61, %v216_v13 }
  0x48   :  { %v235_v19 = vadd.f32 %v234_v12, %v231_v16 }
  0x49   :  { %v220_v22 = vadd.f32 %v219_v17, %v200_v14  ;;  %v224_v23 = vadd.f32 %v223_v18, %v204_v15 }
  0x4a   :  { %v236_v0 = vmax.f32 %v235_v19, 0.0 }
  0x4c   :  { %v239_v24 = vmul.f32 %v238_v20, %v236_v0  ;;  %v243_v25 = vmul.f32 %v242_v21, %v236_v0 }
  0x4e   :  { %v240_v26 = vadd.f32 %v239_v24, %v220_v22  ;;  %v244_v1 = vadd.f32 %v243_v25, %v224_v23 }
  0x50   :  { %245 = vst [vmem:[#allocation7] sm:$0xf] %v240_v26  ;;  %247 = vst [vmem:[#allocation7 + $0x4] sm:$0xf] %v244_v1 }
  0x51   :  { %358 = shalt.err (!%p355_p0)
}
  0x52   :  { %s359_s23 = scalar_lea.hbm %s594_s3, 128 }
  0x53   :  { %p360_p1 = scmp.ne.s32.totalorder %s594_s3, %s359_s23  ;;  %p363_p2 = scmp.lt.u32.totalorder %s359_s23, %s594_s3 }
  0x55   :  { %p365_p3 = pnand %p363_p2, %p360_p1 }
  0x57   :  { %368 = shalt.err (!%p365_p3)
}
  0x58   :  { %s380_s28 = smov 64   ;;  %s381_s29 = smov 4  }
  0x59   :  { %259 = dma.vmem_to_hbm [thread:$0]  %s254_s21, 128, %s594_s3, [#allocation3], %s380_s28, %s380_s28, %s381_s29  }
  0x5a   :  { %373 = dma.done.wait [#allocation3], 128  }
  0x5b   :  { %374 = vsyncadd [#allocation3], 4294967168 }
  0x5c   :  { %263 = vsyncpa [#allocation3], 1 }
  0x5d   :  { %264 = vsyncpa [#allocation4], 1 }
  0x5e   :  { %265 = vsyncpa [#allocation6], 1 }

</bundles_post_ra>
